<compile_context>
chip_gen: v5e
topology: v5e:2x2
jax: 0.10.0
libtpu: 0.0.40
codegen_flags: <defaults>
</compile_context>

<pallas_src>
import functools

import numpy as np
import jax
import jax.numpy as jnp
from jax import lax
from jax.experimental import pallas as pl
from jax.experimental.pallas import tpu as pltpu


def _shuffle_gather_kernel(idx_ref, x_ref, o_ref):
    # idx_ref: (Bb, R)      int32  gather indexes for this batch group
    # x_ref  : (Bb, T, Cp)         input patches, batch-major
    # o_ref  : (Bb, R, Cp)         gathered output
    idx = idx_ref[...]                                   # (Bb, R)
    bb, r = idx.shape
    t = x_ref.shape[1]
    # One-hot selection matrix P[b, r, t] = (t == idx[b, r]).
    iota_t = lax.broadcasted_iota(jnp.int32, (bb, r, t), 2)
    onehot = (idx[:, :, None] == iota_t).astype(x_ref.dtype)    # (Bb, R, T)
    # Row selection by a 0/1 matrix on the MXU: bit-exact (one 1.0 per row).
    o_ref[...] = jnp.einsum(
        "brt,btc->brc", onehot, x_ref[...],
        preferred_element_type=jnp.float32,
    ).astype(o_ref.dtype)


def _pick_block_b(B):
    # The idx block is (Bb, R) with Bb as the second-to-last dim, so Bb must be
    # a multiple of 8 or equal to the full batch. 8 keeps the double-buffered
    # VMEM footprint small even on v7x's 64 MiB VMEM for realistic MAE sizes.
    if B <= 8:
        return B
    if B % 8 == 0:
        return 8
    return B


@functools.partial(jax.jit, static_argnames=("ratio",))
def patch_shuffle(patches, key, *, ratio):
    """patches: (T, B, C). Returns (shuffled_remain (T', B, C), fwd (T,B), bwd (T,B))."""
    T, B, C = patches.shape
    remain_T = int(T * (1 - ratio))
    if remain_T <= 0:
        raise ValueError("mask ratio leaves no patches (remain_T == 0)")

    # Per-batch random permutations, one fused vmapped op (no Python-loop
    # trace blowup). RNG stream intentionally differs from np.random.shuffle.
    keys = jax.random.split(key, B)
    fwd_bt = jax.vmap(lambda k: jax.random.permutation(k, T))(keys).astype(jnp.int32)  # (B, T)
    bwd_bt = jnp.argsort(fwd_bt, axis=-1).astype(jnp.int32)                            # (B, T)
    forward_indexes = jnp.transpose(fwd_bt)    # (T, B) — PyTorch layout
    backward_indexes = jnp.transpose(bwd_bt)   # (T, B)

    # Batch-major layout for the kernel.
    x_btc = jnp.transpose(patches, (1, 0, 2))  # (B, T, C)

    # Lane-dense last dim (multiple of 128); the selection matmul only ever
    # produces zeros in the padded lanes, which are sliced off below.
    Cp = ((C + 127) // 128) * 128
    if Cp != C:
        x_btc = jnp.pad(x_btc, ((0, 0), (0, 0), (0, Cp - C)))

    idx = fwd_bt[:, :remain_T]                 # (B, remain_T) int32

    Bb = _pick_block_b(B)
    grid = (B // Bb,)

    out_btc = pl.pallas_call(
        _shuffle_gather_kernel,
        out_shape=jax.ShapeDtypeStruct((B, remain_T, Cp), patches.dtype),
        grid=grid,
        in_specs=[
            pl.BlockSpec((Bb, remain_T), lambda g: (g, 0)),
            pl.BlockSpec((Bb, T, Cp), lambda g: (g, 0, 0)),
        ],
        out_specs=pl.BlockSpec((Bb, remain_T, Cp), lambda g: (g, 0, 0)),
        compiler_params=pltpu.CompilerParams(
            dimension_semantics=("parallel",)),   # B axis is fully independent
    )(idx, x_btc)

    out = jnp.transpose(out_btc[:, :, :C], (1, 0, 2))   # (remain_T, B, C)
    return out, forward_indexes, backward_indexes


if __name__ == "__main__":
    root = jax.random.PRNGKey(0)

    # Small shapes consistent with the module (T = (H/P)^2 patches, emb dim C).
    cases = [
        (16, 2, 32, 0.75),     # pads C 32 -> 128, single grid step (Bb = B)
        (16, 16, 128, 0.5),    # already lane-dense, 2 grid steps (Bb = 8)
    ]

    for i, (T, B, C, ratio) in enumerate(cases):
        k_data, k_perm = jax.random.split(jax.random.fold_in(root, i))
        patches = jax.random.normal(k_data, (T, B, C), dtype=jnp.float32)

        out, fwd, bwd = patch_shuffle(patches, k_perm, ratio=ratio)
        jax.block_until_ready(out)

        remain_T = int(T * (1 - ratio))
        assert out.shape == (remain_T, B, C)

        # Pure-JAX reference of gather + truncation — must match bit-exactly.
        idx_full = jnp.broadcast_to(fwd[:, :, None], (T, B, C))
        ref = jnp.take_along_axis(patches, idx_full, axis=0)[:remain_T]
        np.testing.assert_allclose(np.asarray(out), np.asarray(ref), rtol=0, atol=0)

        # backward_indexes really inverts forward_indexes per batch element.
        fwd_np, bwd_np = np.asarray(fwd), np.asarray(bwd)
        for b in range(B):
            assert np.array_equal(fwd_np[:, b][bwd_np[:, b]], np.arange(T))

    print("KERNEL_OK")
</pallas_src>

<mosaic_0001>
module attributes {stable_mosaic.version = 11 : i64} {
  func.func @_shuffle_gather_kernel(%arg0: i32, %arg1: memref<2x4xi32, #tpu.memory_space<vmem>>, %arg2: memref<2x16x128xf32, #tpu.memory_space<vmem>>, %arg3: memref<2x4x128xf32, #tpu.memory_space<vmem>>) attributes {dimension_semantics = [#tpu.dimension_semantics<parallel>], iteration_bounds = array<i64: 1>, scalar_prefetch = 0 : i64, scratch_operands = 0 : i64, tpu.core_type = #tpu.core_type<tc>, window_params = [{transform_indices = @transform_0, window_bounds = array<i64: 2, 4>}, {transform_indices = @transform_1, window_bounds = array<i64: 2, 16, 128>}, {transform_indices = @transform_2, window_bounds = array<i64: 2, 4, 128>}]} {
    %c0 = arith.constant 0 : index
    %c0_0 = arith.constant 0 : index
    %0 = vector.load %arg1[%c0, %c0_0] : memref<2x4xi32, #tpu.memory_space<vmem>>, vector<2x4xi32>
    %1 = tpu.iota {dimensions = array<i32: 2>} : vector<2x4x16xi32>
    %2 = vector.shape_cast %0 : vector<2x4xi32> to vector<2x4x1xi32>
    %3 = vector.broadcast %2 : vector<2x4x1xi32> to vector<2x4x16xi32>
    %4 = arith.cmpi eq, %3, %1 : vector<2x4x16xi32>
    %5 = arith.extui %4 : vector<2x4x16xi1> to vector<2x4x16xi32>
    %6 = arith.sitofp %5 : vector<2x4x16xi32> to vector<2x4x16xf32>
    %c0_1 = arith.constant 0 : index
    %c0_2 = arith.constant 0 : index
    %c0_3 = arith.constant 0 : index
    %7 = vector.load %arg2[%c0_1, %c0_2, %c0_3] : memref<2x16x128xf32, #tpu.memory_space<vmem>>, vector<2x16x128xf32>
    "tpu.trace_start"() <{level = 10 : i32, message = "brt,btc->brc"}> : () -> ()
    %cst = arith.constant dense<0.000000e+00> : vector<2x4x128xf32>
    %8 = tpu.matmul %6, %7, %cst {dimension_numbers = #tpu.dot_dimension_numbers<[2], [1], [1], [2], [0, 0, 0, 1, 1, 2], [0], [0]>} : vector<2x4x16xf32>, vector<2x16x128xf32>, vector<2x4x128xf32> -> vector<2x4x128xf32>
    "tpu.trace_stop"() : () -> ()
    %c0_4 = arith.constant 0 : index
    %c0_5 = arith.constant 0 : index
    %c0_6 = arith.constant 0 : index
    %9 = vector.load %arg3[%c0_4, %c0_5, %c0_6] : memref<2x4x128xf32, #tpu.memory_space<vmem>>, vector<2x4x128xf32>
    tpu.vector_store %arg3[%c0_4, %c0_5, %c0_6], %8 {strides = array<i32>} : memref<2x4x128xf32, #tpu.memory_space<vmem>>, vector<2x4x128xf32>,
    return
  }
  func.func @transform_0(%arg0: i32) -> (i32, i32) {
    %c0_i32 = arith.constant 0 : i32
    %c0_i32_0 = arith.constant 0 : i32
    return %arg0, %c0_i32 : i32, i32
  }
  func.func @transform_1(%arg0: i32) -> (i32, i32, i32) {
    %c0_i32 = arith.constant 0 : i32
    %c0_i32_0 = arith.constant 0 : i32
    %c0_i32_1 = arith.constant 0 : i32
    return %arg0, %c0_i32, %c0_i32_0 : i32, i32, i32
  }
  func.func @transform_2(%arg0: i32) -> (i32, i32, i32) {
    %c0_i32 = arith.constant 0 : i32
    %c0_i32_0 = arith.constant 0 : i32
    %c0_i32_1 = arith.constant 0 : i32
    return %arg0, %c0_i32, %c0_i32_0 : i32, i32, i32
  }
}

</mosaic_0001>

<bundles_post_ra>
// kernel: patch_shuffle.1
= control target key start
LH: loop header
LB: loop body
LE: loop exit
PB: predicated region body
PF: predicated region fallthrough
CT: control target
= control target key end

     0   :  { %v12_v0 = vlaneseq  ;;  %vm38_vm0 = vcmask 130048   ;;  %v97_v11 = vmov 0.0   ;;  %s134_s1 = inlined_call_operand.vmem [shape: f32[2,16,128], index: 1, kind: input, shape index: {}]   ;;  %s135_s0 = inlined_call_operand.vmem [shape: s32[2,4], index: 0, kind: input, shape index: {}]   ;;  %s136_s2 = inlined_call_operand.vmem [shape: f32[2,4,128], index: 2, kind: output, shape index: {}]  }
   0x1   :  { %v35_v1 = vld [vmem:[%s134_s1 + $0x8] sm:$0xff]  ;;  %v11_v3 = vld [vmem:[%s135_s0] sm:$0x3]  ;;  %v37_v7 = vld [vmem:[%s134_s1 + $0x18] sm:$0xff] }
   0x2   :  { %v16_v2 = vshrl.u32 %v12_v0, 7  ;;  %56 = vmatpush.msra.mxu0 %v35_v1  ;;  %v14_v4 = vperm.slane %v11_v3, 0  ;;  %v21_v5 = vperm.slane %v11_v3, 1  ;;  %v34_v6 = vld [vmem:[%s134_s1] sm:$0xff]  ;;  %79 = vmatpush.msra.mxu1 %v37_v7  ;;  %v36_v8 = vld [vmem:[%s134_s1 + $0x10] sm:$0xff]  ;;  %v13_v9 = vand.u32 127, %v12_v0 }
   0x4   :  { %96 = vset.pattern.permute.xlu0 %v16_v2  ;;  %57 = vmatpush.msra.mxu0 %v34_v6 }
   0x5   :  { %80 = vmatpush.msra.mxu1 %v36_v8 }
   0xc   :  { %19 = vperm.xlu0 %96, %v14_v4  }
  0x14   :  { %26 = vperm.xlu0 %96, %v21_v5  }
  0x7e   :  { %v20_v10 = vpop.permute.xlu0 %19 }
  0x7f   :  { %vm28_vm1 = vcmp.eq.s32.totalorder %v20_v10, %v13_v9 }
  0x80   :  { %v91_v12 = vsel %vm28_vm1, 1.0, %v97_v11 }
  0x81   :  { %93 = vmatmul.msk.f32.vlgmr.msra.gmra.mxu0 %vm38_vm0, %v91_v12 }
  0x86   :  { %v27_v13 = vpop.permute.xlu0 %26 }
  0x87   :  { %vm29_vm2 = vcmp.eq.s32.totalorder %v27_v13, %v13_v9 }
  0x88   :  { %v92_v14 = vsel %vm29_vm2, 1.0, %v97_v11 }
  0x89   :  { %94 = vmatmul.msk.f32.vlgmr.msra.gmra.mxu1 %vm38_vm0, %v92_v14 }
  0xfe   :  { %v59_v15 = vpop.f32.mrf.mxu0 }
  0xff   :  { %85 = vst [vmem:[%s136_s2] sm:$0xf] %v59_v15 }
 0x106   :  { %v82_v16 = vpop.f32.mrf.mxu1 }
 0x107   :  { %86 = vst [vmem:[%s136_s2 + $0x4] sm:$0xf] %v82_v16 }

</bundles_post_ra>
